<compile_context>
chip_gen: v6e
topology: v6e:2x2x1
jax: 0.10.0
libtpu: 0.0.40
codegen_flags: <defaults>
</compile_context>

<pallas_src>
import math

import jax
import jax.numpy as jnp
from jax.experimental import pallas as pl
from jax.experimental.pallas import tpu as pltpu


def _build_pe(d_model: int, max_len: int = 5000) -> jnp.ndarray:
    """Deterministic sinusoidal table, identical math to the torch __init__."""
    position = jnp.arange(0, max_len, dtype=jnp.float32)[:, None]            # [max_len, 1]
    div_term = jnp.exp(
        jnp.arange(0, d_model, 2, dtype=jnp.float32) * (-math.log(10000.0) / d_model)
    )                                                                         # [d_model//2]
    pe = jnp.zeros((max_len, d_model), dtype=jnp.float32)
    pe = pe.at[:, 0::2].set(jnp.sin(position * div_term))
    pe = pe.at[:, 1::2].set(jnp.cos(position * div_term))
    # torch: pe.unsqueeze(0).transpose(0, 1) -> [max_len, 1, d_model]
    return pe[:, None, :]


def _pe_add_kernel(x_ref, pe_ref, o_ref):
    # x_ref / o_ref: (TS, B*D) lane-dense tiles; pe_ref: (1, B*D) resident row.
    # Pure load-add-store: single VPU add, no extra stores or dtype churn.
    o_ref[...] = x_ref[...] + pe_ref[...]


def positional_encoding_forward(
    x: jnp.ndarray, pe: jnp.ndarray, *, tile_bytes: int = 2 * 1024 * 1024
) -> jnp.ndarray:
    S, B, D = x.shape
    # The literal torch broadcast ([B,S,D] + [S,1,D]) only resolves when S == B.
    assert S == B, "literal PyTorch forward requires seq_len == batch for the broadcast"

    N = B * D
    # Glue (reshape/slice only): lane-dense 2-D views.
    x2d = x.reshape(S, N)
    pe_row = pe[:B, 0, :].astype(x.dtype).reshape(1, N)   # out[s] = x2d[s] + pe_row

    # Row-tile size: multiple of 8 rows, sized to ~tile_bytes; whole array in one
    # block when it already fits (the small test shape takes this path).
    row_bytes = N * jnp.dtype(x.dtype).itemsize
    ts = max(8, (tile_bytes // max(row_bytes, 1)) // 8 * 8)
    if ts >= S:
        ts = S                      # full-extent block (exempt from 8-divisibility)
    grid = (pl.cdiv(S, ts),)

    out2d = pl.pallas_call(
        _pe_add_kernel,
        out_shape=jax.ShapeDtypeStruct((S, N), x.dtype),
        grid=grid,
        in_specs=[
            pl.BlockSpec((ts, N), lambda i: (i, 0)),
            # pe row: same block every step -> effectively resident, no re-fetch.
            pl.BlockSpec((1, N), lambda i: (0, 0)),
        ],
        out_specs=pl.BlockSpec((ts, N), lambda i: (i, 0)),
        # "parallel" lets the row-tile axis shard across v7x's 2 TensorCores;
        # harmless no-op on v5e/v6e.
        compiler_params=pltpu.CompilerParams(dimension_semantics=("parallel",)),
        # NOTE: input_output_aliases={0: 0} is a valid extra win when embedded in
        # a larger model (x2d is dead after the add); omitted here so the caller's
        # x stays readable for the reference check.
    )(x2d, pe_row)

    return out2d.reshape(S, B, D)


if __name__ == "__main__":
    d_model = 32
    seq_len = 8
    batch = 8  # must equal seq_len for the literal torch broadcast to be valid

    key = jax.random.PRNGKey(0)
    x = jax.random.normal(key, (seq_len, batch, d_model), dtype=jnp.float32)

    pe = _build_pe(d_model, max_len=5000)

    out = positional_encoding_forward(x, pe)
    out = jax.block_until_ready(out)

    # Pure-JAX reference reproducing the literal torch forward (p=0 dropout).
    ref = jnp.transpose(jnp.transpose(x, (1, 0, 2)) + pe[: x.shape[0]], (1, 0, 2))
    assert out.shape == x.shape and out.dtype == x.dtype
    assert jnp.allclose(out, ref, atol=1e-6)
    print("KERNEL_OK")
</pallas_src>

<mosaic_0001>
module attributes {stable_mosaic.version = 11 : i64} {
  func.func @_pe_add_kernel(%arg0: i32, %arg1: memref<8x256xf32, #tpu.memory_space<vmem>>, %arg2: memref<1x256xf32, #tpu.memory_space<vmem>>, %arg3: memref<8x256xf32, #tpu.memory_space<vmem>>) attributes {dimension_semantics = [#tpu.dimension_semantics<parallel>], iteration_bounds = array<i64: 1>, scalar_prefetch = 0 : i64, scratch_operands = 0 : i64, tpu.core_type = #tpu.core_type<tc>, window_params = [{transform_indices = @transform_0, window_bounds = array<i64: 8, 256>}, {pipeline_mode = #tpu.pipeline_mode<synchronous>, transform_indices = @transform_1, window_bounds = array<i64: 1, 256>}, {transform_indices = @transform_2, window_bounds = array<i64: 8, 256>}]} {
    %c0 = arith.constant 0 : index
    %c0_0 = arith.constant 0 : index
    %0 = vector.load %arg1[%c0, %c0_0] : memref<8x256xf32, #tpu.memory_space<vmem>>, vector<8x256xf32>
    %c0_1 = arith.constant 0 : index
    %c0_2 = arith.constant 0 : index
    %1 = vector.load %arg2[%c0_1, %c0_2] : memref<1x256xf32, #tpu.memory_space<vmem>>, vector<1x256xf32>
    %2 = vector.broadcast %1 : vector<1x256xf32> to vector<8x256xf32>
    %3 = arith.addf %0, %2 : vector<8x256xf32>
    %c0_3 = arith.constant 0 : index
    %c0_4 = arith.constant 0 : index
    %4 = vector.load %arg3[%c0_3, %c0_4] : memref<8x256xf32, #tpu.memory_space<vmem>>, vector<8x256xf32>
    tpu.vector_store %arg3[%c0_3, %c0_4], %3 {strides = array<i32>} : memref<8x256xf32, #tpu.memory_space<vmem>>, vector<8x256xf32>,
    return
  }
  func.func @transform_0(%arg0: i32) -> (i32, i32) {
    %c0_i32 = arith.constant 0 : i32
    %c0_i32_0 = arith.constant 0 : i32
    return %arg0, %c0_i32 : i32, i32
  }
  func.func @transform_1(%arg0: i32) -> (i32, i32) {
    %c0_i32 = arith.constant 0 : i32
    %c0_i32_0 = arith.constant 0 : i32
    %c0_i32_1 = arith.constant 0 : i32
    return %c0_i32, %c0_i32_0 : i32, i32
  }
  func.func @transform_2(%arg0: i32) -> (i32, i32) {
    %c0_i32 = arith.constant 0 : i32
    %c0_i32_0 = arith.constant 0 : i32
    return %arg0, %c0_i32 : i32, i32
  }
}

</mosaic_0001>

<bundles_post_ra>
// kernel: tpu_custom_call.1
= control target key start
LH: loop header
LB: loop body
LE: loop exit
PB: predicated region body
PF: predicated region fallthrough
CT: control target
= control target key end

     0   :  { %7 = vsyncpa [#allocation3], 0  ;;  %s166_s0 = inlined_call_operand.hbm [shape: f32[8,256], index: 0, kind: input, shape index: {}]   ;;  %s167_s1 = inlined_call_operand.hbm [shape: f32[1,256], index: 1, kind: input, shape index: {}]   ;;  %s168_s2 = inlined_call_operand.hbm [shape: f32[8,256], index: 2, kind: output, shape index: {}]  }
   0x1   :  { %8 = vsyncpa [#allocation6], 0 }
   0x2   :  { %9 = vsyncpa [#allocation4], 0  ;;  %s139_s9 = smov [#allocation2]   ;;  %s140_s11 = smov [#allocation5]  }
   0x3   :  { %s16_s10 = sshll.u32 %s139_s9, 4  ;;  %s26_s12 = sshll.u32 %s140_s11, 4  ;;  %s17_s10 = int_to_ptr.vmem [resolvable:$true] %s16_s10  ;;  %s27_s12 = int_to_ptr.vmem [resolvable:$true] %s26_s12 }
   0x4   :  { %s81_s13 = scalar_lea.vmem %s17_s10, 256  ;;  %p86_p1 = scmp.lt.s32.totalorder %s17_s10, %s17_s10 }
   0x5   :  { %p82_p0 = scmp.ne.s32.totalorder %s17_s10, %s81_s13  ;;  %p87_p2 = scmp.lt.s32.totalorder %s81_s13, %s81_s13 }
   0x7   :  { %p88_p3 = por %p87_p2, %p86_p1 }
   0x9   :  { %p89_p4 = pnand %p88_p3, %p82_p0 }
   0xb   :  { %92 = shalt.err (!%p89_p4)
}
   0xc   :  { %19 = dma.hbm_to_vmem [thread:$0]  %s166_s0, 256, %s17_s10, [#allocation3]  }
   0xd   :  { %s101_s16 = scalar_lea.vmem %s27_s12, 32  ;;  %p106_p6 = scmp.lt.s32.totalorder %s27_s12, %s27_s12 }
   0xe   :  { %p102_p5 = scmp.ne.s32.totalorder %s27_s12, %s101_s16  ;;  %p107_p7 = scmp.lt.s32.totalorder %s101_s16, %s101_s16 }
  0x10   :  { %p108_p8 = por %p107_p7, %p106_p6 }
  0x12   :  { %p109_p9 = pnand %p108_p8, %p102_p5 }
  0x14   :  { %112 = shalt.err (!%p109_p9)
}
  0x15   :  { %29 = dma.hbm_to_vmem [thread:$0]  %s167_s1, 32, %s27_s12, [#allocation6]  }
  0x16   :  { %133 = dma.done.wait [#allocation3], 256  }
  0x17   :  { %134 = vsyncadd [#allocation3], 4294967040 }
  0x18   :  { %135 = dma.done.wait [#allocation6], 32  }
  0x19   :  { %136 = vsyncadd [#allocation6], 4294967264  ;;  %v40_v0 = vlaneseq  ;;  %v36_v4 = vld [vmem:[#allocation2] sm:$0xff]  ;;  %v38_v5 = vld [vmem:[#allocation5] sm:$0x3]  ;;  %s141_s0 = smov [#allocation7]  }
  0x1a   :  { %v37_v6 = vld [vmem:[#allocation2 + $0x8] sm:$0xff]  ;;  %s60_s19 = sshll.u32 %s141_s0, 4  ;;  %s61_s19 = int_to_ptr.vmem [resolvable:$true] %s60_s19 }
  0x1b   :  { %v41_v1 = vshrl.u32 %v40_v0, 7  ;;  %s113_s1 = scalar_lea.vmem %s61_s19, 256  ;;  %p118_p11 = scmp.lt.s32.totalorder %s61_s19, %s61_s19 }
  0x1c   :  { %p114_p10 = scmp.ne.s32.totalorder %s61_s19, %s113_s1  ;;  %p119_p12 = scmp.lt.s32.totalorder %s113_s1, %s113_s1 }
  0x1d   :  { %v42_v2 = vsub.s32 0, %v41_v1  ;;  %v46_v3 = vsub.s32 1, %v41_v1 }
  0x1e   :  { %p120_p13 = por %p119_p12, %p118_p11 }
  0x1f   :  { %v43_v7 = vrot.slane %v38_v5, %v42_v2  ;;  %v47_v8 = vrot.slane %v38_v5, %v46_v3 }
  0x20   :  { %p121_p0 = pnand %p120_p13, %p114_p10 }
  0x21   :  { %v50_v9 = vadd.f32 %v43_v7, %v36_v4  ;;  %v51_v10 = vadd.f32 %v47_v8, %v37_v6 }
  0x23   :  { %52 = vst [vmem:[#allocation7] sm:$0xff] %v50_v9  ;;  %53 = vst [vmem:[#allocation7 + $0x8] sm:$0xff] %v51_v10 }
  0x24   :  { %124 = shalt.err (!%p121_p0)
}
  0x25   :  { %63 = dma.vmem_to_hbm [thread:$0]  %s61_s19, 256, %s168_s2, [#allocation4]  }
  0x26   :  { %137 = dma.done.wait [#allocation4], 256  }
  0x27   :  { %138 = vsyncadd [#allocation4], 4294967040 }
  0x28   :  { %67 = vsyncpa [#allocation3], 1 }
  0x29   :  { %68 = vsyncpa [#allocation6], 1 }
  0x2a   :  { %69 = vsyncpa [#allocation4], 1 }

</bundles_post_ra>
